<compile_context>
chip_gen: v7x
topology: tpu7x:2x2x1
jax: 0.10.0
libtpu: 0.0.40
codegen_flags: <defaults>
</compile_context>

<pallas_src>
import math

import jax
import jax.numpy as jnp
from jax.experimental import pallas as pl
from jax.experimental.pallas import tpu as pltpu

SIGMA = 0.1   # IsotropicGaussian sigma (default sigma=0.1, sigma_trainable=False)
LANE = 128


def nae_forward_kernel(x_ref, we1_ref, be1_ref, we2_ref, be2_ref,
                       wd1_ref, bd1_ref, wd2_ref, bd2_ref, out_ref):
    x = x_ref[...]                                            # (TM, D) f32
    D = x.shape[1]
    x_bf = x.astype(jnp.bfloat16)

    # ---- encoder: Linear -> ReLU -> Linear (bf16 MXU matmuls, f32 acc) ----
    h = jnp.dot(x_bf, we1_ref[...],
                preferred_element_type=jnp.float32) + be1_ref[...]
    h = jnp.maximum(h, 0.0)
    z = jnp.dot(h.astype(jnp.bfloat16), we2_ref[...],
                preferred_element_type=jnp.float32) + be2_ref[...]

    # ---- spherical normalization: z / ||z||_2 per sample (f32, EUP rsqrt) ----
    z_sq = jnp.sum(z * z, axis=-1, keepdims=True)             # (TM, 1)
    z = z * jax.lax.rsqrt(z_sq)

    # ---- decoder: Linear -> ReLU -> Linear (mean of IsotropicGaussian) ----
    hd = jnp.dot(z.astype(jnp.bfloat16), wd1_ref[...],
                 preferred_element_type=jnp.float32) + bd1_ref[...]
    hd = jnp.maximum(hd, 0.0)
    xhat = jnp.dot(hd.astype(jnp.bfloat16), wd2_ref[...],
                   preferred_element_type=jnp.float32) + bd2_ref[...]

    # ---- Gaussian log-likelihood -> NAE energy (all f32) ----
    diff = x - xhat
    sq_err = jnp.sum(diff * diff, axis=-1, keepdims=True)     # (TM, 1)
    const = -D * 0.5 * math.log(2.0 * math.pi * SIGMA * SIGMA)
    loglik = const - 0.5 * sq_err / (SIGMA * SIGMA)
    out_ref[...] = -loglik / D                                # (TM, 1)


def _round_up(n, m):
    return (n + m - 1) // m * m


def _pick_batch_tile(B):
    # Largest power-of-two tile (<=256) dividing B; fall back to full B
    # (block_shape equal to the full dim satisfies the (8,128) rule).
    for tm in (256, 128, 64, 32, 16, 8):
        if B % tm == 0:
            return tm
    return B


def nae_forward(x_nchw, params):
    """x_nchw: (B, C, H, W) float32. Returns per-sample energy, shape (B,)."""
    B = x_nchw.shape[0]
    D = int(math.prod(x_nchw.shape[1:]))
    x = x_nchw.reshape(B, D).astype(jnp.float32)
    we1, be1, we2, be2, wd1, bd1, wd2, bd2 = params

    # --- pad latent dim to a full 128-lane width (zero lanes are inert) ---
    d_z = we2.shape[1]
    d_zp = _round_up(d_z, LANE)
    if d_zp != d_z:
        pad = d_zp - d_z
        we2 = jnp.pad(we2, ((0, 0), (0, pad)))
        be2 = jnp.pad(be2, ((0, 0), (0, pad)))
        wd1 = jnp.pad(wd1, ((0, pad), (0, 0)))

    # --- bf16 matmul operands; biases stay f32 ---
    we1_b = we1.astype(jnp.bfloat16)
    we2_b = we2.astype(jnp.bfloat16)
    wd1_b = wd1.astype(jnp.bfloat16)
    wd2_b = wd2.astype(jnp.bfloat16)
    be1 = be1.astype(jnp.float32)
    be2 = be2.astype(jnp.float32)
    bd1 = bd1.astype(jnp.float32)
    bd2 = bd2.astype(jnp.float32)

    tm = _pick_batch_tile(B)
    grid = (B // tm,)

    def pinned(shape):
        # constant block index -> stays resident in VMEM across grid steps
        nd = len(shape)
        return pl.BlockSpec(shape, lambda i, _nd=nd: (0,) * _nd)

    out = pl.pallas_call(
        nae_forward_kernel,
        out_shape=jax.ShapeDtypeStruct((B, 1), jnp.float32),
        grid=grid,
        in_specs=[pl.BlockSpec((tm, D), lambda i: (i, 0)),
                  pinned(we1_b.shape), pinned(be1.shape),
                  pinned(we2_b.shape), pinned(be2.shape),
                  pinned(wd1_b.shape), pinned(bd1.shape),
                  pinned(wd2_b.shape), pinned(bd2.shape)],
        out_specs=pl.BlockSpec((tm, 1), lambda i: (i, 0)),
        compiler_params=pltpu.CompilerParams(
            dimension_semantics=("parallel",),
            vmem_limit_bytes=32 * 1024 * 1024),
    )(x, we1_b, be1, we2_b, be2, wd1_b, bd1, wd2_b, bd2)
    return out[:, 0]


def init_params(key, d_in, d_hidden, d_z):
    """Deterministic synthetic weights. Linear weights stored (in, out)."""
    ks = jax.random.split(key, 8)

    def lin(kw, fan_in, fan_out):
        scale = 1.0 / math.sqrt(fan_in)
        return jax.random.uniform(kw, (fan_in, fan_out), jnp.float32,
                                  minval=-scale, maxval=scale)

    we1 = lin(ks[0], d_in, d_hidden)
    be1 = jax.random.uniform(ks[1], (1, d_hidden), jnp.float32, -0.01, 0.01)
    we2 = lin(ks[2], d_hidden, d_z)
    be2 = jax.random.uniform(ks[3], (1, d_z), jnp.float32, -0.01, 0.01)
    wd1 = lin(ks[4], d_z, d_hidden)
    bd1 = jax.random.uniform(ks[5], (1, d_hidden), jnp.float32, -0.01, 0.01)
    wd2 = lin(ks[6], d_hidden, d_in)
    bd2 = jax.random.uniform(ks[7], (1, d_in), jnp.float32, -0.01, 0.01)
    return (we1, be1, we2, be2, wd1, bd1, wd2, bd2)


def nae_forward_ref(x_nchw, params):
    """Pure-JAX reference with the same bf16-matmul / f32-math recipe."""
    we1, be1, we2, be2, wd1, bd1, wd2, bd2 = params
    B = x_nchw.shape[0]
    D = int(math.prod(x_nchw.shape[1:]))
    x = x_nchw.reshape(B, D).astype(jnp.float32)
    bf = jnp.bfloat16

    h = jnp.dot(x.astype(bf), we1.astype(bf),
                preferred_element_type=jnp.float32) + be1
    h = jnp.maximum(h, 0.0)
    z = jnp.dot(h.astype(bf), we2.astype(bf),
                preferred_element_type=jnp.float32) + be2
    z = z * jax.lax.rsqrt(jnp.sum(z * z, axis=-1, keepdims=True))
    hd = jnp.dot(z.astype(bf), wd1.astype(bf),
                 preferred_element_type=jnp.float32) + bd1
    hd = jnp.maximum(hd, 0.0)
    xhat = jnp.dot(hd.astype(bf), wd2.astype(bf),
                   preferred_element_type=jnp.float32) + bd2

    sq_err = jnp.sum((x - xhat) ** 2, axis=-1)
    const = -D * 0.5 * math.log(2.0 * math.pi * SIGMA * SIGMA)
    loglik = const - 0.5 * sq_err / (SIGMA * SIGMA)
    return -loglik / D


if __name__ == "__main__":
    B, C, H, W = 2, 4, 16, 16           # x: NCHW
    D_HIDDEN, D_Z = 128, 32
    D_IN = C * H * W

    key = jax.random.PRNGKey(0)
    kx, kp = jax.random.split(key)
    x = jax.random.normal(kx, (B, C, H, W), jnp.float32)
    params = init_params(kp, D_IN, D_HIDDEN, D_Z)

    energy = jax.block_until_ready(nae_forward(x, params))
    energy_ref = nae_forward_ref(x, params)

    assert energy.shape == (B,)
    assert bool(jnp.all(jnp.isfinite(energy)))
    assert jnp.allclose(energy, energy_ref, rtol=1e-3, atol=1e-3), (
        energy, energy_ref)
    print("KERNEL_OK")
</pallas_src>

<mosaic_0001>
module attributes {stable_mosaic.version = 11 : i64} {
  func.func @nae_forward_kernel(%arg0: i32, %arg1: memref<2x1024xf32, #tpu.memory_space<vmem>>, %arg2: memref<1024x128xbf16, #tpu.memory_space<vmem>>, %arg3: memref<1x128xf32, #tpu.memory_space<vmem>>, %arg4: memref<128x128xbf16, #tpu.memory_space<vmem>>, %arg5: memref<1x128xf32, #tpu.memory_space<vmem>>, %arg6: memref<128x128xbf16, #tpu.memory_space<vmem>>, %arg7: memref<1x128xf32, #tpu.memory_space<vmem>>, %arg8: memref<128x1024xbf16, #tpu.memory_space<vmem>>, %arg9: memref<1x1024xf32, #tpu.memory_space<vmem>>, %arg10: memref<2x1xf32, #tpu.memory_space<vmem>>) attributes {dimension_semantics = [#tpu.dimension_semantics<parallel>], iteration_bounds = array<i64: 1>, scalar_prefetch = 0 : i64, scratch_operands = 0 : i64, tpu.core_type = #tpu.core_type<tc>, window_params = [{transform_indices = @transform_0, window_bounds = array<i64: 2, 1024>}, {pipeline_mode = #tpu.pipeline_mode<synchronous>, transform_indices = @transform_1, window_bounds = array<i64: 1024, 128>}, {pipeline_mode = #tpu.pipeline_mode<synchronous>, transform_indices = @transform_2, window_bounds = array<i64: 1, 128>}, {pipeline_mode = #tpu.pipeline_mode<synchronous>, transform_indices = @transform_3, window_bounds = array<i64: 128, 128>}, {pipeline_mode = #tpu.pipeline_mode<synchronous>, transform_indices = @transform_4, window_bounds = array<i64: 1, 128>}, {pipeline_mode = #tpu.pipeline_mode<synchronous>, transform_indices = @transform_5, window_bounds = array<i64: 128, 128>}, {pipeline_mode = #tpu.pipeline_mode<synchronous>, transform_indices = @transform_6, window_bounds = array<i64: 1, 128>}, {pipeline_mode = #tpu.pipeline_mode<synchronous>, transform_indices = @transform_7, window_bounds = array<i64: 128, 1024>}, {pipeline_mode = #tpu.pipeline_mode<synchronous>, transform_indices = @transform_8, window_bounds = array<i64: 1, 1024>}, {transform_indices = @transform_9, window_bounds = array<i64: 2, 1>}]} {
    %c0 = arith.constant 0 : index
    %c0_0 = arith.constant 0 : index
    %0 = vector.load %arg1[%c0, %c0_0] : memref<2x1024xf32, #tpu.memory_space<vmem>>, vector<2x1024xf32>
    %1 = arith.truncf %0 : vector<2x1024xf32> to vector<2x1024xbf16>
    %c0_1 = arith.constant 0 : index
    %c0_2 = arith.constant 0 : index
    %2 = vector.load %arg2[%c0_1, %c0_2] : memref<1024x128xbf16, #tpu.memory_space<vmem>>, vector<1024x128xbf16>
    %cst = arith.constant dense<0.000000e+00> : vector<2x128xf32>
    %3 = tpu.matmul %1, %2, %cst {dimension_numbers = #tpu.dot_dimension_numbers<[1], [0], [0], [1], [0, 0, 1, 1], [], []>} : vector<2x1024xbf16>, vector<1024x128xbf16>, vector<2x128xf32> -> vector<2x128xf32>
    %c0_3 = arith.constant 0 : index
    %c0_4 = arith.constant 0 : index
    %4 = vector.load %arg3[%c0_3, %c0_4] : memref<1x128xf32, #tpu.memory_space<vmem>>, vector<1x128xf32>
    %5 = vector.broadcast %4 : vector<1x128xf32> to vector<2x128xf32>
    %6 = arith.addf %3, %5 : vector<2x128xf32>
    %cst_5 = arith.constant 0.000000e+00 : f32
    %7 = vector.broadcast %cst_5 : f32 to vector<2x128xf32>
    %8 = arith.maximumf %6, %7 : vector<2x128xf32>
    %9 = arith.truncf %8 : vector<2x128xf32> to vector<2x128xbf16>
    %c0_6 = arith.constant 0 : index
    %c0_7 = arith.constant 0 : index
    %10 = vector.load %arg4[%c0_6, %c0_7] : memref<128x128xbf16, #tpu.memory_space<vmem>>, vector<128x128xbf16>
    %cst_8 = arith.constant dense<0.000000e+00> : vector<2x128xf32>
    %11 = tpu.matmul %9, %10, %cst_8 {dimension_numbers = #tpu.dot_dimension_numbers<[1], [0], [0], [1], [0, 0, 1, 1], [], []>} : vector<2x128xbf16>, vector<128x128xbf16>, vector<2x128xf32> -> vector<2x128xf32>
    %c0_9 = arith.constant 0 : index
    %c0_10 = arith.constant 0 : index
    %12 = vector.load %arg5[%c0_9, %c0_10] : memref<1x128xf32, #tpu.memory_space<vmem>>, vector<1x128xf32>
    %13 = vector.broadcast %12 : vector<1x128xf32> to vector<2x128xf32>
    %14 = arith.addf %11, %13 : vector<2x128xf32>
    %15 = arith.mulf %14, %14 : vector<2x128xf32>
    %cst_11 = arith.constant dense<0.000000e+00> : vector<2xf32>
    %16 = vector.multi_reduction <add>, %15, %cst_11 [1] : vector<2x128xf32> to vector<2xf32>
    %17 = vector.shape_cast %16 : vector<2xf32> to vector<2x1xf32>
    %18 = math.rsqrt %17 : vector<2x1xf32>
    %19 = vector.broadcast %18 : vector<2x1xf32> to vector<2x128xf32>
    %20 = arith.mulf %14, %19 : vector<2x128xf32>
    %21 = arith.truncf %20 : vector<2x128xf32> to vector<2x128xbf16>
    %c0_12 = arith.constant 0 : index
    %c0_13 = arith.constant 0 : index
    %22 = vector.load %arg6[%c0_12, %c0_13] : memref<128x128xbf16, #tpu.memory_space<vmem>>, vector<128x128xbf16>
    %cst_14 = arith.constant dense<0.000000e+00> : vector<2x128xf32>
    %23 = tpu.matmul %21, %22, %cst_14 {dimension_numbers = #tpu.dot_dimension_numbers<[1], [0], [0], [1], [0, 0, 1, 1], [], []>} : vector<2x128xbf16>, vector<128x128xbf16>, vector<2x128xf32> -> vector<2x128xf32>
    %c0_15 = arith.constant 0 : index
    %c0_16 = arith.constant 0 : index
    %24 = vector.load %arg7[%c0_15, %c0_16] : memref<1x128xf32, #tpu.memory_space<vmem>>, vector<1x128xf32>
    %25 = vector.broadcast %24 : vector<1x128xf32> to vector<2x128xf32>
    %26 = arith.addf %23, %25 : vector<2x128xf32>
    %cst_17 = arith.constant 0.000000e+00 : f32
    %27 = vector.broadcast %cst_17 : f32 to vector<2x128xf32>
    %28 = arith.maximumf %26, %27 : vector<2x128xf32>
    %29 = arith.truncf %28 : vector<2x128xf32> to vector<2x128xbf16>
    %c0_18 = arith.constant 0 : index
    %c0_19 = arith.constant 0 : index
    %30 = vector.load %arg8[%c0_18, %c0_19] : memref<128x1024xbf16, #tpu.memory_space<vmem>>, vector<128x1024xbf16>
    %cst_20 = arith.constant dense<0.000000e+00> : vector<2x1024xf32>
    %31 = tpu.matmul %29, %30, %cst_20 {dimension_numbers = #tpu.dot_dimension_numbers<[1], [0], [0], [1], [0, 0, 1, 1], [], []>} : vector<2x128xbf16>, vector<128x1024xbf16>, vector<2x1024xf32> -> vector<2x1024xf32>
    %c0_21 = arith.constant 0 : index
    %c0_22 = arith.constant 0 : index
    %32 = vector.load %arg9[%c0_21, %c0_22] : memref<1x1024xf32, #tpu.memory_space<vmem>>, vector<1x1024xf32>
    %33 = vector.broadcast %32 : vector<1x1024xf32> to vector<2x1024xf32>
    %34 = arith.addf %31, %33 : vector<2x1024xf32>
    %35 = arith.subf %0, %34 : vector<2x1024xf32>
    %36 = arith.mulf %35, %35 : vector<2x1024xf32>
    %cst_23 = arith.constant dense<0.000000e+00> : vector<2xf32>
    %37 = vector.multi_reduction <add>, %36, %cst_23 [1] : vector<2x1024xf32> to vector<2xf32>
    %38 = vector.shape_cast %37 : vector<2xf32> to vector<2x1xf32>
    %cst_24 = arith.constant 5.000000e-01 : f32
    %39 = vector.broadcast %cst_24 : f32 to vector<2x1xf32>
    %40 = arith.mulf %39, %38 : vector<2x1xf32>
    %cst_25 = arith.constant 0.00999999977 : f32
    %41 = vector.broadcast %cst_25 : f32 to vector<2x1xf32>
    %42 = arith.divf %40, %41 : vector<2x1xf32>
    %cst_26 = arith.constant 1416.85413 : f32
    %43 = vector.broadcast %cst_26 : f32 to vector<2x1xf32>
    %44 = arith.subf %43, %42 : vector<2x1xf32>
    %cst_27 = arith.constant 0.000000e+00 : f32
    %45 = vector.broadcast %cst_27 : f32 to vector<2x1xf32>
    %46 = arith.subf %45, %44 : vector<2x1xf32>
    %cst_28 = arith.constant 1.024000e+03 : f32
    %47 = vector.broadcast %cst_28 : f32 to vector<2x1xf32>
    %48 = arith.divf %46, %47 : vector<2x1xf32>
    %c0_29 = arith.constant 0 : index
    %c0_30 = arith.constant 0 : index
    %49 = vector.load %arg10[%c0_29, %c0_30] : memref<2x1xf32, #tpu.memory_space<vmem>>, vector<2x1xf32>
    tpu.vector_store %arg10[%c0_29, %c0_30], %48 {strides = array<i32>} : memref<2x1xf32, #tpu.memory_space<vmem>>, vector<2x1xf32>,
    return
  }
  func.func @transform_0(%arg0: i32) -> (i32, i32) {
    %c0_i32 = arith.constant 0 : i32
    %c0_i32_0 = arith.constant 0 : i32
    return %arg0, %c0_i32 : i32, i32
  }
  func.func @transform_1(%arg0: i32) -> (i32, i32) {
    %c0_i32 = arith.constant 0 : i32
    %c0_i32_0 = arith.constant 0 : i32
    %c0_i32_1 = arith.constant 0 : i32
    return %c0_i32, %c0_i32_0 : i32, i32
  }
  func.func @transform_2(%arg0: i32) -> (i32, i32) {
    %c0_i32 = arith.constant 0 : i32
    %c0_i32_0 = arith.constant 0 : i32
    %c0_i32_1 = arith.constant 0 : i32
    return %c0_i32, %c0_i32_0 : i32, i32
  }
  func.func @transform_3(%arg0: i32) -> (i32, i32) {
    %c0_i32 = arith.constant 0 : i32
    %c0_i32_0 = arith.constant 0 : i32
    %c0_i32_1 = arith.constant 0 : i32
    return %c0_i32, %c0_i32_0 : i32, i32
  }
  func.func @transform_4(%arg0: i32) -> (i32, i32) {
    %c0_i32 = arith.constant 0 : i32
    %c0_i32_0 = arith.constant 0 : i32
    %c0_i32_1 = arith.constant 0 : i32
    return %c0_i32, %c0_i32_0 : i32, i32
  }
  func.func @transform_5(%arg0: i32) -> (i32, i32) {
    %c0_i32 = arith.constant 0 : i32
    %c0_i32_0 = arith.constant 0 : i32
    %c0_i32_1 = arith.constant 0 : i32
    return %c0_i32, %c0_i32_0 : i32, i32
  }
  func.func @transform_6(%arg0: i32) -> (i32, i32) {
    %c0_i32 = arith.constant 0 : i32
    %c0_i32_0 = arith.constant 0 : i32
    %c0_i32_1 = arith.constant 0 : i32
    return %c0_i32, %c0_i32_0 : i32, i32
  }
  func.func @transform_7(%arg0: i32) -> (i32, i32) {
    %c0_i32 = arith.constant 0 : i32
    %c0_i32_0 = arith.constant 0 : i32
    %c0_i32_1 = arith.constant 0 : i32
    return %c0_i32, %c0_i32_0 : i32, i32
  }
  func.func @transform_8(%arg0: i32) -> (i32, i32) {
    %c0_i32 = arith.constant 0 : i32
    %c0_i32_0 = arith.constant 0 : i32
    %c0_i32_1 = arith.constant 0 : i32
    return %c0_i32, %c0_i32_0 : i32, i32
  }
  func.func @transform_9(%arg0: i32) -> (i32, i32) {
    %c0_i32 = arith.constant 0 : i32
    %c0_i32_0 = arith.constant 0 : i32
    return %arg0, %c0_i32 : i32, i32
  }
}

</mosaic_0001>

<bundles_post_ra>
// kernel: tpu_custom_call.1
= control target key start
LH: loop header
LB: loop body
LE: loop exit
PB: predicated region body
PF: predicated region fallthrough
CT: control target
= control target key end

     0   :  { %14 = vsyncpa [#allocation3], 0  ;;  %s2504_s0 = inlined_call_operand.hbm [shape: f32[2,1024], index: 0, kind: input, shape index: {}]   ;;  %s2505_s1 = inlined_call_operand.hbm [shape: bf16[1024,128], index: 1, kind: input, shape index: {}]   ;;  %s2506_s2 = inlined_call_operand.vmem [shape: f32[1,128], index: 2, kind: input, shape index: {}]   ;;  %s2507_s3 = inlined_call_operand.hbm [shape: bf16[128,128], index: 3, kind: input, shape index: {}]   ;;  %s2508_s4 = inlined_call_operand.vmem [shape: f32[1,128], index: 4, kind: input, shape index: {}]   ;;  %s2509_s5 = inlined_call_operand.hbm [shape: bf16[128,128], index: 5, kind: input, shape index: {}]   ;;  %s2510_s6 = inlined_call_operand.vmem [shape: f32[1,128], index: 6, kind: input, shape index: {}]   ;;  %s2511_s7 = inlined_call_operand.hbm [shape: bf16[128,1024], index: 7, kind: input, shape index: {}]   ;;  %s2512_s8 = inlined_call_operand.vmem [shape: f32[1,1024], index: 8, kind: input, shape index: {}]   ;;  %s2513_s9 = inlined_call_operand.vmem [shape: f32[2,1], index: 9, kind: output, shape index: {}]  }
   0x1   :  { %15 = vsyncpa [#allocation5], 0 }
   0x2   :  { %16 = vsyncpa [#allocation8], 0  ;;  %s2288_s30 = smov [#allocation4]   ;;  %s2172_s13 = scalar_lea.hbm %s2505_s1, 8192 }
   0x3   :  { %s32_s10 = sshll.u32 %s2288_s30, 4  ;;  %p2173_p0 = scmp.ne.s32.totalorder %s2505_s1, %s2172_s13  ;;  %s33_s10 = int_to_ptr.vmem [resolvable:$true] %s32_s10 }
   0x4   :  { %p2176_p1 = scmp.lt.u32.totalorder %s2172_s13, %s2505_s1 }
   0x6   :  { %p2178_p2 = pnand %p2176_p1, %p2173_p0 }
   0x8   :  { %2181 = shalt.err (!%p2178_p2)
}
   0x9   :  { %s2182_s18 = scalar_lea.vmem %s33_s10, 8192  ;;  %p2187_p4 = scmp.lt.s32.totalorder %s33_s10, %s33_s10 }
   0xa   :  { %p2183_p3 = scmp.ne.s32.totalorder %s33_s10, %s2182_s18  ;;  %p2188_p5 = scmp.lt.s32.totalorder %s2182_s18, %s2182_s18 }
   0xc   :  { %p2189_p6 = por %p2188_p5, %p2187_p4 }
   0xe   :  { %p2190_p7 = pnand %p2189_p6, %p2183_p3 }
  0x10   :  { %2193 = shalt.err (!%p2190_p7)
}
  0x11   :  { %s2289_s19 = smov 64   ;;  %s2290_s20 = smov 4  }
  0x12   :  { %38 = dma.hbm_to_vmem [thread:$0]  %s2505_s1, 8192, %s33_s10, [#allocation5], %s2289_s19, %s2289_s19, %s2290_s20  }
  0x13   :  { %s2291_s23 = smov [#allocation7]   ;;  %s2292_s25 = smov [#allocation2]  }
  0x14   :  { %s60_s24 = sshll.u32 %s2291_s23, 4  ;;  %s23_s26 = sshll.u32 %s2292_s25, 4  ;;  %s61_s24 = int_to_ptr.vmem [resolvable:$true] %s60_s24  ;;  %s24_s26 = int_to_ptr.vmem [resolvable:$true] %s23_s26 }
  0x15   :  { %s2194_s29 = scalar_lea.hbm %s2509_s5, 1024 }
  0x16   :  { %p2195_p8 = scmp.ne.s32.totalorder %s2509_s5, %s2194_s29  ;;  %p2198_p9 = scmp.lt.u32.totalorder %s2194_s29, %s2509_s5 }
  0x18   :  { %p2200_p10 = pnand %p2198_p9, %p2195_p8 }
  0x1a   :  { %2203 = shalt.err (!%p2200_p10)
}
  0x1b   :  { %s2204_s1 = scalar_lea.vmem %s61_s24, 1024  ;;  %p2209_p12 = scmp.lt.s32.totalorder %s61_s24, %s61_s24 }
  0x1c   :  { %p2205_p11 = scmp.ne.s32.totalorder %s61_s24, %s2204_s1  ;;  %p2210_p13 = scmp.lt.s32.totalorder %s2204_s1, %s2204_s1 }
  0x1e   :  { %p2211_p0 = por %p2210_p13, %p2209_p12 }
  0x20   :  { %p2212_p1 = pnand %p2211_p0, %p2205_p11 }
  0x22   :  { %2215 = shalt.err (!%p2212_p1)
}
  0x23   :  { %66 = dma.hbm_to_vmem [thread:$0]  %s2509_s5, 1024, %s61_s24, [#allocation8], %s2289_s19, %s2289_s19, %s2290_s20  }
  0x24   :  { %s2216_s17 = scalar_lea.hbm %s2504_s0, 256 }
  0x25   :  { %p2217_p2 = scmp.ne.s32.totalorder %s2504_s0, %s2216_s17  ;;  %p2220_p3 = scmp.lt.u32.totalorder %s2216_s17, %s2504_s0 }
  0x27   :  { %p2222_p4 = pnand %p2220_p3, %p2217_p2 }
  0x29   :  { %2225 = shalt.err (!%p2222_p4)
}
  0x2a   :  { %s2226_s25 = scalar_lea.vmem %s24_s26, 256  ;;  %p2231_p6 = scmp.lt.s32.totalorder %s24_s26, %s24_s26 }
  0x2b   :  { %p2227_p5 = scmp.ne.s32.totalorder %s24_s26, %s2226_s25  ;;  %p2232_p7 = scmp.lt.s32.totalorder %s2226_s25, %s2226_s25 }
  0x2d   :  { %p2233_p8 = por %p2232_p7, %p2231_p6 }
  0x2f   :  { %p2234_p9 = pnand %p2233_p8, %p2227_p5 }
  0x31   :  { %2237 = shalt.err (!%p2234_p9)
}
  0x32   :  { %26 = dma.hbm_to_vmem [thread:$0]  %s2504_s0, 256, %s24_s26, [#allocation3]  }
  0x33   :  { %s2293_s27 = smov [#allocation6]   ;;  %s2294_s29 = smov [#allocation9]  }
  0x34   :  { %s46_s28 = sshll.u32 %s2293_s27, 4  ;;  %s74_s30 = sshll.u32 %s2294_s29, 4  ;;  %s47_s28 = int_to_ptr.vmem [resolvable:$true] %s46_s28  ;;  %s75_s30 = int_to_ptr.vmem [resolvable:$true] %s74_s30 }
  0x35   :  { %s2238_s13 = scalar_lea.hbm %s2507_s3, 1024 }
  0x36   :  { %p2239_p10 = scmp.ne.s32.totalorder %s2507_s3, %s2238_s13  ;;  %p2242_p11 = scmp.lt.u32.totalorder %s2238_s13, %s2507_s3 }
  0x38   :  { %p2244_p12 = pnand %p2242_p11, %p2239_p10 }
  0x3a   :  { %2247 = shalt.err (!%p2244_p12)
}
  0x3b   :  { %s2248_s0 = scalar_lea.vmem %s47_s28, 1024  ;;  %p2253_p0 = scmp.lt.s32.totalorder %s47_s28, %s47_s28 }
  0x3c   :  { %p2249_p13 = scmp.ne.s32.totalorder %s47_s28, %s2248_s0  ;;  %p2254_p1 = scmp.lt.s32.totalorder %s2248_s0, %s2248_s0 }
  0x3e   :  { %p2255_p2 = por %p2254_p1, %p2253_p0 }
  0x40   :  { %p2256_p3 = pnand %p2255_p2, %p2249_p13 }
  0x42   :  { %2259 = shalt.err (!%p2256_p3)
}
  0x43   :  { %52 = dma.hbm_to_vmem [thread:$0]  %s2507_s3, 1024, %s47_s28, [#allocation5], %s2289_s19, %s2289_s19, %s2290_s20  }
  0x44   :  { %s2260_s21 = scalar_lea.hbm %s2511_s7, 8192 }
  0x45   :  { %p2261_p4 = scmp.ne.s32.totalorder %s2511_s7, %s2260_s21  ;;  %p2264_p5 = scmp.lt.u32.totalorder %s2260_s21, %s2511_s7 }
  0x47   :  { %p2266_p6 = pnand %p2264_p5, %p2261_p4 }
  0x49   :  { %2269 = shalt.err (!%p2266_p6)
}
  0x4a   :  { %s2270_s24 = scalar_lea.vmem %s75_s30, 8192  ;;  %p2275_p8 = scmp.lt.s32.totalorder %s75_s30, %s75_s30 }
  0x4b   :  { %p2271_p7 = scmp.ne.s32.totalorder %s75_s30, %s2270_s24  ;;  %p2276_p9 = scmp.lt.s32.totalorder %s2270_s24, %s2270_s24 }
  0x4d   :  { %p2277_p10 = por %p2276_p9, %p2275_p8 }
  0x4f   :  { %p2278_p11 = pnand %p2277_p10, %p2271_p7 }
  0x51   :  { %2281 = shalt.err (!%p2278_p11)
}
  0x52   :  { %s2295_s3 = smov 512   ;;  %s2296_s19 = smov 32  }
  0x53   :  { %80 = dma.hbm_to_vmem [thread:$0]  %s2511_s7, 8192, %s75_s30, [#allocation8], %s2295_s3, %s2295_s3, %s2296_s19  }
  0x54   :  { %2282 = dma.done.wait [#allocation3], 256  }
  0x55   :  { %2283 = vsyncadd [#allocation3], 4294967040 }
  0x56   :  { %2284 = dma.done.wait [#allocation5], 9216  }
  0x57   :  { %2285 = vsyncadd [#allocation5], 4294958080 }
  0x58   :  { %2286 = dma.done.wait [#allocation8], 9216  }
  0x59   :  { %2287 = vsyncadd [#allocation8], 4294958080  ;;  %v2087_v0 = vld [vmem:[#allocation4 + $0x40] sm:$0xff]   ;;  %v2091_v4 = vld [vmem:[#allocation4 + $0x48] sm:$0xff]   ;;  %v2297_v22 = vmov 1983009808   ;;  %v107_v24 = vlaneseq }
  0x5a   :  { %v2088_v1 = vld [vmem:[#allocation4 + $0xc0] sm:$0xff]   ;;  %1928 = vmatprep.subr.bf16.mxu0 %v2087_v0  ;;  %v2092_v5 = vld [vmem:[#allocation4 + $0xc8] sm:$0xff]   ;;  %v2095_v8 = vld [vmem:[#allocation4 + $0x50] sm:$0xff]   ;;  %v105_v23 = vunpack.c.l.s4 %v2297_v22  ;;  %vm2299_vm0 = vmmov 0   ;;  %vm946_vm1 = vcmask 1041408   ;;  %vm1772_vm2 = vcmask 1024  }
  0x5b   :  { %v2089_v2 = vld [vmem:[#allocation4] sm:$0xff]   ;;  %1950 = vmatprep.subr.bf16.mxu1 %v2088_v1  ;;  %v2093_v6 = vld [vmem:[#allocation4 + $0x8] sm:$0xff]   ;;  %v2096_v9 = vld [vmem:[#allocation4 + $0xd0] sm:$0xff]   ;;  %v2420_v30 = vshrl.u32 %v107_v24, 7 }
  0x5c   :  { %v2090_v3 = vld [vmem:[#allocation4 + $0x80] sm:$0xff]   ;;  %1929 = vmatpush3.bf16.msra.mxu0 %v2089_v2  ;;  %v2094_v7 = vld [vmem:[#allocation4 + $0x88] sm:$0xff]   ;;  %v2097_v10 = vld [vmem:[#allocation4 + $0x10] sm:$0xff]   ;;  %v106_v29 = vunpack.c.0.s8 %v105_v23 }
  0x5d   :  { %1951 = vmatpush3.bf16.msra.mxu1 %v2090_v3  ;;  %1930 = vmatprep.subr.bf16.mxu0 %v2091_v4  ;;  %v2098_v11 = vld [vmem:[#allocation4 + $0x90] sm:$0xff]   ;;  %v2099_v12 = vld [vmem:[#allocation4 + $0x58] sm:$0xff]   ;;  %v2103_v16 = vld [vmem:[#allocation4 + $0x60] sm:$0xff]  }
  0x5e   :  { %1952 = vmatprep.subr.bf16.mxu1 %v2092_v5  ;;  %v2100_v13 = vld [vmem:[#allocation4 + $0xd8] sm:$0xff]   ;;  %v2104_v17 = vld [vmem:[#allocation4 + $0xe0] sm:$0xff]   ;;  %v2107_v20 = vld [vmem:[#allocation4 + $0x68] sm:$0xff]   ;;  %v2423_v35 = vsub.s32 %v106_v29, %v2420_v30 }
  0x5f   :  { %v2101_v14 = vld [vmem:[#allocation4 + $0x18] sm:$0xff]   ;;  %v2105_v18 = vld [vmem:[#allocation4 + $0x20] sm:$0xff]   ;;  %v2108_v21 = vld [vmem:[#allocation4 + $0xe8] sm:$0xff]  }
  0x60   :  { %1931 = vmatpush3.bf16.msra.mxu0 %v2093_v6  ;;  %v2102_v15 = vld [vmem:[#allocation4 + $0x98] sm:$0xff]   ;;  %v2106_v19 = vld [vmem:[#allocation4 + $0xa0] sm:$0xff]   ;;  %v2109_v25 = vld [vmem:[#allocation4 + $0x28] sm:$0xff]  }
  0x61   :  { %1953 = vmatpush3.bf16.msra.mxu1 %v2094_v7  ;;  %1932 = vmatprep.subr.bf16.mxu0 %v2095_v8  ;;  %v2110_v26 = vld [vmem:[#allocation4 + $0xa8] sm:$0xff]   ;;  %v2111_v27 = vld [vmem:[#allocation4 + $0x70] sm:$0xff]   ;;  %v2115_v33 = vld [vmem:[#allocation4 + $0x78] sm:$0xff]  }
  0x62   :  { %1954 = vmatprep.subr.bf16.mxu1 %v2096_v9  ;;  %v2112_v28 = vld [vmem:[#allocation4 + $0xf0] sm:$0xff]   ;;  %v2116_v34 = vld [vmem:[#allocation4 + $0xf8] sm:$0xff]   ;;  %v2120_v41 = vld [vmem:[#allocation4 + $0x140] sm:$0xff]  }
  0x63   :  { %v2113_v31 = vld [vmem:[#allocation4 + $0x30] sm:$0xff]   ;;  %v2117_v36 = vld [vmem:[#allocation4 + $0x38] sm:$0xff]   ;;  %v2121_v42 = vld [vmem:[#allocation4 + $0x1c0] sm:$0xff]  }
  0x64   :  { %1933 = vmatpush3.bf16.msra.mxu0 %v2097_v10  ;;  %v2114_v32 = vld [vmem:[#allocation4 + $0xb0] sm:$0xff]   ;;  %v2118_v37 = vld [vmem:[#allocation4 + $0xb8] sm:$0xff]   ;;  %v2122_v46 = vld [vmem:[#allocation4 + $0x100] sm:$0xff]  }
  0x65   :  { %1955 = vmatpush3.bf16.msra.mxu1 %v2098_v11  ;;  %1934 = vmatprep.subr.bf16.mxu0 %v2099_v12  ;;  %v99_v38 = vld [vmem:[#allocation2] sm:$0xff]  ;;  %v2123_v49 = vld [vmem:[#allocation4 + $0x180] sm:$0xff]   ;;  %v2124_v51 = vld [vmem:[#allocation4 + $0x148] sm:$0xff]  }
  0x66   :  { %1956 = vmatprep.subr.bf16.mxu1 %v2100_v13  ;;  %v110_v39 = vrot.slane %v99_v38, %v2423_v35  ;;  %v103_v40 = vcombine.high %v99_v38, %v99_v38  ;;  %v2125_v53 = vld [vmem:[#allocation4 + $0x1c8] sm:$0xff]   ;;  %v2128_v56 = vld [vmem:[#allocation4 + $0x150] sm:$0xff]   ;;  %v2132_v60 = vld [vmem:[#allocation4 + $0x158] sm:$0xff]  }
  0x67   :  { %v2126_v54 = vld [vmem:[#allocation4 + $0x108] sm:$0xff]   ;;  %v2129_v57 = vld [vmem:[#allocation4 + $0x1d0] sm:$0xff]   ;;  %v2133_v61 = vld [vmem:[#allocation4 + $0x1d8] sm:$0xff]  }
  0x68   :  { %1935 = vmatpush3.bf16.msra.mxu0 %v2101_v14  ;;  %v118_v43 = vcombine.high %v110_v39, %v110_v39  ;;  %v117_v44 = vrot.slane %v103_v40, %v2423_v35  ;;  %v145_v45 = vpack.c.bf16 %v110_v39, %v110_v39  ;;  %v2127_v55 = vld [vmem:[#allocation4 + $0x188] sm:$0xff]   ;;  %v2130_v58 = vld [vmem:[#allocation4 + $0x110] sm:$0xff]   ;;  %v2134_v62 = vld [vmem:[#allocation4 + $0x118] sm:$0xff]  }
  0x69   :  { %1957 = vmatpush3.bf16.msra.mxu1 %v2102_v15  ;;  %1936 = vmatprep.subr.bf16.mxu0 %v2103_v16  ;;  %v2131_v59 = vld [vmem:[#allocation4 + $0x190] sm:$0xff]   ;;  %v2135_v63 = vld [vmem:[#allocation4 + $0x198] sm:$0xff]   ;;  %v2136_v0 = vld [vmem:[#allocation4 + $0x160] sm:$0xff]  }
  0x6a   :  { %1958 = vmatprep.subr.bf16.mxu1 %v2104_v17  ;;  %v146_v47 = vpack.c.bf16 %v118_v43, %v118_v43  ;;  %v119_v48 = vcombine.high %v117_v44, %v117_v44  ;;  %v147_v50 = vpack.c.bf16 %v117_v44, %v117_v44  ;;  %v2137_v1 = vld [vmem:[#allocation4 + $0x1e0] sm:$0xff]   ;;  %v2140_v4 = vld [vmem:[#allocation4 + $0x168] sm:$0xff]   ;;  %v2144_v8 = vld [vmem:[#allocation4 + $0x170] sm:$0xff]  }
  0x6b   :  { %v2138_v2 = vld [vmem:[#allocation4 + $0x120] sm:$0xff]   ;;  %v2141_v5 = vld [vmem:[#allocation4 + $0x1e8] sm:$0xff]   ;;  %v2145_v9 = vld [vmem:[#allocation4 + $0x1f0] sm:$0xff]  }
  0x6c   :  { %1937 = vmatpush3.bf16.msra.mxu0 %v2105_v18  ;;  %704 = vmatprep.mubr.bf16.mxu0 %v146_v47  ;;  %v148_v52 = vpack.c.bf16 %v119_v48, %v119_v48  ;;  %v2139_v3 = vld [vmem:[#allocation4 + $0x1a0] sm:$0xff]   ;;  %v2142_v6 = vld [vmem:[#allocation4 + $0x128] sm:$0xff]   ;;  %v2146_v10 = vld [vmem:[#allocation4 + $0x130] sm:$0xff]  }
  0x6d   :  { %1959 = vmatpush3.bf16.msra.mxu1 %v2106_v19  ;;  %1938 = vmatprep.subr.bf16.mxu0 %v2107_v20  ;;  %v2143_v7 = vld [vmem:[#allocation4 + $0x1a8] sm:$0xff]   ;;  %v2147_v11 = vld [vmem:[#allocation4 + $0x1b0] sm:$0xff]   ;;  %v2148_v12 = vld [vmem:[#allocation4 + $0x178] sm:$0xff]  }
  0x6e   :  { %1960 = vmatprep.subr.bf16.mxu1 %v2108_v21  ;;  %744 = vmatprep.mubr.bf16.mxu1 %v148_v52  ;;  %v2149_v13 = vld [vmem:[#allocation4 + $0x1f8] sm:$0xff]   ;;  %v2155_v29 = vld [vmem:[#allocation6 + $0x10] sm:$0xff]  }
  0x6f   :  { %v2150_v14 = vld [vmem:[#allocation4 + $0x138] sm:$0xff]   ;;  %v1781_v38 = vld [vmem:[%s2506_s2] ss:$0 sm:$0xff] }
  0x70   :  { %1939 = vmatpush3.bf16.msra.mxu0 %v2109_v25  ;;  %v2427_v15 = vld [vmem:[#allocation2 + $0x8] sm:$0xff] }
  0x71   :  { %1961 = vmatpush3.bf16.msra.mxu1 %v2110_v26  ;;  %1940 = vmatprep.subr.bf16.mxu0 %v2111_v27  ;;  %v2151_v16 = vld [vmem:[#allocation4 + $0x1b8] sm:$0xff]   ;;  %v127_v17 = vrot.slane %v2427_v15, %v2423_v35  ;;  %v120_v18 = vcombine.high %v2427_v15, %v2427_v15  ;;  %v2153_v26 = vld [vmem:[#allocation6] sm:$0xff]   ;;  %v2298_v27 = vmov 0.0  }
  0x72   :  { %1962 = vmatprep.subr.bf16.mxu1 %v2112_v28  ;;  %v2154_v28 = vld [vmem:[#allocation6 + $0x8] sm:$0xff]  }
  0x73   :  { %v135_v19 = vcombine.high %v127_v17, %v127_v17  ;;  %v134_v20 = vrot.slane %v120_v18, %v2423_v35  ;;  %v149_v21 = vpack.c.bf16 %v127_v17, %v127_v17  ;;  %v1066_v17 = vld [vmem:[#allocation9] sm:$0xff] }
  0x74   :  { %1941 = vmatpush3.bf16.msra.mxu0 %v2113_v31  ;;  %v2156_v31 = vld [vmem:[#allocation6 + $0x18] sm:$0xff]   ;;  %v1070_v18 = vld [vmem:[#allocation9 + $0x20] sm:$0xff] }
  0x75   :  { %1963 = vmatpush3.bf16.msra.mxu1 %v2114_v32  ;;  %1942 = vmatprep.subr.bf16.mxu0 %v2115_v33  ;;  %v150_v22 = vpack.c.bf16 %v135_v19, %v135_v19  ;;  %v136_v23 = vcombine.high %v134_v20, %v134_v20  ;;  %v151_v24 = vpack.c.bf16 %v134_v20, %v134_v20  ;;  %v2157_v32 = vld [vmem:[#allocation6 + $0x20] sm:$0xff]   ;;  %v2158_v33 = vld [vmem:[#allocation6 + $0x28] sm:$0xff]  }
  0x76   :  { %1964 = vmatprep.subr.bf16.mxu1 %v2116_v34  ;;  %v2159_v34 = vld [vmem:[#allocation6 + $0x30] sm:$0xff]   ;;  %v1067_v19 = vld [vmem:[#allocation9 + $0x8] sm:$0xff]  ;;  %v1864_v20 = vcombine.low %v1066_v17, %v1070_v18 }
  0x77   :  { %v152_v25 = vpack.c.bf16 %v136_v23, %v136_v23  ;;  %v1074_v23 = vld [vmem:[#allocation9 + $0x40] sm:$0xff] }
  0x78   :  { %1943 = vmatpush3.bf16.msra.mxu0 %v2117_v36  ;;  %v2160_v36 = vld [vmem:[#allocation6 + $0x38] sm:$0xff]  }
  0x79   :  { %1965 = vmatpush3.bf16.msra.mxu1 %v2118_v37  ;;  %1972 = vmatprep.subr.bf16.mxu0 %v2120_v41 }
  0x7a   :  { %1994 = vmatprep.subr.bf16.mxu1 %v2121_v42 }
  0x7b   :  { %705 = vmatmul.mubr.bf16.vlgmr.msra.gmra.mrb[0].mxu0 %v145_v45 }
  0x7c   :  { %1973 = vmatpush3.bf16.msra.mxu0 %v2122_v46  ;;  %745 = vmatmul.mubr.bf16.vlgmr.msra.gmra.mrb[0].mxu1 %v147_v50 }
  0x7d   :  { %1974 = vmatprep.subr.bf16.mxu0 %v2124_v51  ;;  %1995 = vmatpush3.bf16.msra.mxu1 %v2123_v49 }
  0x7e   :  { %1996 = vmatprep.subr.bf16.mxu1 %v2125_v53  ;;  %784 = vmatprep.mubr.bf16.mxu0 %v150_v22  ;;  %v1071_v22 = vld [vmem:[#allocation9 + $0x28] sm:$0xff] }
  0x7f   :  { %824 = vmatprep.mubr.bf16.mxu1 %v152_v25  ;;  %v1866_v25 = vcombine.low %v1067_v19, %v1071_v22 }
  0x80   :  { %1975 = vmatpush3.bf16.msra.mxu0 %v2126_v54 }
  0x81   :  { %1976 = vmatprep.subr.bf16.mxu0 %v2128_v56  ;;  %1997 = vmatpush3.bf16.msra.mxu1 %v2127_v55 }
  0x82   :  { %1998 = vmatprep.subr.bf16.mxu1 %v2129_v57 }
  0x84   :  { %1977 = vmatpush3.bf16.msra.mxu0 %v2130_v58 }
  0x85   :  { %1978 = vmatprep.subr.bf16.mxu0 %v2132_v60  ;;  %1999 = vmatpush3.bf16.msra.mxu1 %v2131_v59 }
  0x86   :  { %2000 = vmatprep.subr.bf16.mxu1 %v2133_v61 }
  0x88   :  { %1979 = vmatpush3.bf16.msra.mxu0 %v2134_v62 }
  0x89   :  { %1980 = vmatprep.subr.bf16.mxu0 %v2136_v0  ;;  %2001 = vmatpush3.bf16.msra.mxu1 %v2135_v63  ;;  %v2161_v0 = vld [vmem:[#allocation7] sm:$0xff]  }
  0x8a   :  { %2002 = vmatprep.subr.bf16.mxu1 %v2137_v1  ;;  %v2162_v1 = vld [vmem:[#allocation7 + $0x8] sm:$0xff]  }
  0x8c   :  { %1981 = vmatpush3.bf16.msra.mxu0 %v2138_v2  ;;  %v2163_v2 = vld [vmem:[#allocation7 + $0x10] sm:$0xff]  }
  0x8d   :  { %1982 = vmatprep.subr.bf16.mxu0 %v2140_v4  ;;  %2003 = vmatpush3.bf16.msra.mxu1 %v2139_v3  ;;  %v2164_v3 = vld [vmem:[#allocation7 + $0x18] sm:$0xff]   ;;  %v1846_v4 = vld [vmem:[%s2508_s4] ss:$0 sm:$0xff] }
  0x8e   :  { %2004 = vmatprep.subr.bf16.mxu1 %v2141_v5 }
  0x90   :  { %1983 = vmatpush3.bf16.msra.mxu0 %v2142_v6 }
  0x91   :  { %1984 = vmatprep.subr.bf16.mxu0 %v2144_v8  ;;  %2005 = vmatpush3.bf16.msra.mxu1 %v2143_v7 }
  0x92   :  { %2006 = vmatprep.subr.bf16.mxu1 %v2145_v9 }
  0x94   :  { %1985 = vmatpush3.bf16.msra.mxu0 %v2146_v10 }
  0x95   :  { %1986 = vmatprep.subr.bf16.mxu0 %v2148_v12  ;;  %2007 = vmatpush3.bf16.msra.mxu1 %v2147_v11  ;;  %v2165_v12 = vld [vmem:[#allocation7 + $0x20] sm:$0xff]  }
  0x96   :  { %2008 = vmatprep.subr.bf16.mxu1 %v2149_v13  ;;  %v2166_v13 = vld [vmem:[#allocation7 + $0x28] sm:$0xff]  }
  0x98   :  { %1987 = vmatpush3.bf16.msra.mxu0 %v2150_v14  ;;  %v2167_v14 = vld [vmem:[#allocation7 + $0x30] sm:$0xff]  }
  0x99   :  { %2009 = vmatpush3.bf16.msra.mxu1 %v2151_v16  ;;  %2034 = vmatprep.subr.bf16.mxu0 %v2298_v27  ;;  %v2168_v16 = vld [vmem:[#allocation7 + $0x38] sm:$0xff]  }
  0x9a   :  { %2054 = vmatprep.subr.bf16.mxu1 %v2298_v27 }
  0x9b   :  { %785 = vmatmul.mubr.bf16.vlgmr.msra.gmra.mrb[4].mxu0 %v149_v21  ;;  %v1865_v21 = vcombine.high %v1066_v17, %v1070_v18  ;;  %v1126_v17 = vld [vmem:[#allocation9 + $0x1e0] sm:$0xff]  ;;  %v1123_v18 = vld [vmem:[#allocation9 + $0x1c8] sm:$0xff] }
  0x9c   :  { %825 = vmatmul.mubr.bf16.vlgmr.msra.gmra.mrb[4].mxu1 %v151_v24  ;;  %2035 = vmatpush3.bf16.msra.mxu0 %v2153_v26  ;;  %v1078_v24 = vld [vmem:[#allocation9 + $0x60] sm:$0xff]  ;;  %v1867_v26 = vcombine.high %v1067_v19, %v1071_v22 }
  0x9d   :  { %2036 = vmatprep.subr.bf16.mxu0 %v2298_v27  ;;  %2050 = vmatprep.mubr.msk.bf16.mxu0 %vm2299_vm0, %v2298_v27 }
  0x9e   :  { %2070 = vmatprep.mubr.msk.bf16.mxu1 %vm2299_vm0, %v2298_v27  ;;  %2055 = vmatpush3.bf16.msra.mxu1 %v2161_v0 }
  0x9f   :  { %2056 = vmatprep.subr.bf16.mxu1 %v2298_v27 }
  0xa0   :  { %2037 = vmatpush3.bf16.msra.mxu0 %v2154_v28  ;;  %v1873_v28 = vcombine.high %v1074_v23, %v1078_v24 }
  0xa1   :  { %2038 = vmatprep.subr.bf16.mxu0 %v2298_v27 }
  0xa2   :  { %2057 = vmatpush3.bf16.msra.mxu1 %v2162_v1 }
  0xa3   :  { %2058 = vmatprep.subr.bf16.mxu1 %v2298_v27 }
  0xa4   :  { %2039 = vmatpush3.bf16.msra.mxu0 %v2155_v29  ;;  %v1872_v29 = vcombine.low %v1074_v23, %v1078_v24  ;;  %v1068_v24 = vld [vmem:[#allocation9 + $0x10] sm:$0xff] }
  0xa5   :  { %2040 = vmatprep.subr.bf16.mxu0 %v2298_v27 }
  0xa6   :  { %2059 = vmatpush3.bf16.msra.mxu1 %v2163_v2  ;;  %v1099_v2 = vld [vmem:[#allocation9 + $0x108] sm:$0xff] }
  0xa7   :  { %2060 = vmatprep.subr.bf16.mxu1 %v2298_v27 }
  0xa8   :  { %2041 = vmatpush3.bf16.msra.mxu0 %v2156_v31  ;;  %v1082_v31 = vld [vmem:[#allocation9 + $0x80] sm:$0xff] }
  0xa9   :  { %2042 = vmatprep.subr.bf16.mxu0 %v2298_v27 }
  0xaa   :  { %2061 = vmatpush3.bf16.msra.mxu1 %v2164_v3  ;;  %v1103_v3 = vld [vmem:[#allocation9 + $0x128] sm:$0xff] }
  0xab   :  { %2062 = vmatprep.subr.bf16.mxu1 %v2298_v27 }
  0xac   :  { %2043 = vmatpush3.bf16.msra.mxu0 %v2157_v32  ;;  %v1086_v32 = vld [vmem:[#allocation9 + $0xa0] sm:$0xff] }
  0xad   :  { %2044 = vmatprep.subr.bf16.mxu0 %v2298_v27 }
  0xae   :  { %2063 = vmatpush3.bf16.msra.mxu1 %v2165_v12 }
  0xaf   :  { %2064 = vmatprep.subr.bf16.mxu1 %v2298_v27 }
  0xb0   :  { %2045 = vmatpush3.bf16.msra.mxu0 %v2158_v33  ;;  %v1880_v33 = vcombine.low %v1082_v31, %v1086_v32 }
  0xb1   :  { %2046 = vmatprep.subr.bf16.mxu0 %v2298_v27 }
  0xb2   :  { %2065 = vmatpush3.bf16.msra.mxu1 %v2166_v13 }
  0xb3   :  { %2066 = vmatprep.subr.bf16.mxu1 %v2298_v27 }
  0xb4   :  { %2047 = vmatpush3.bf16.msra.mxu0 %v2159_v34  ;;  %v1090_v34 = vld [vmem:[#allocation9 + $0xc0] sm:$0xff] }
  0xb5   :  { %2048 = vmatprep.subr.bf16.mxu0 %v2298_v27 }
  0xb6   :  { %2067 = vmatpush3.bf16.msra.mxu1 %v2167_v14 }
  0xb7   :  { %2068 = vmatprep.subr.bf16.mxu1 %v2298_v27  ;;  %v1881_v27 = vcombine.high %v1082_v31, %v1086_v32  ;;  %v1073_v32 = vld [vmem:[#allocation9 + $0x38] sm:$0xff] }
  0xb8   :  { %2049 = vmatpush3.bf16.msra.mxu0 %v2160_v36  ;;  %v1094_v36 = vld [vmem:[#allocation9 + $0xe0] sm:$0xff] }
  0xb9   :  { %1492 = vmatprep.subr.bf16.mxu0 %v1865_v21 }
  0xba   :  { %2069 = vmatpush3.bf16.msra.mxu1 %v2168_v16  ;;  %v1122_v16 = vld [vmem:[#allocation9 + $0x1c0] sm:$0xff] }
  0xbb   :  { %1533 = vmatprep.subr.bf16.mxu1 %v1867_v26  ;;  %v1921_v19 = vcombine.high %v1122_v16, %v1126_v17  ;;  %v1920_v21 = vcombine.low %v1122_v16, %v1126_v17  ;;  %v1069_v26 = vld [vmem:[#allocation9 + $0x18] sm:$0xff] }
 0x14e   :  { %v1944_v37 = vpop.f32.mrb[0].mxu0 }
 0x14f   :  { %v1945_v39 = vpop.f32.mrb[1].mxu0  ;;  %v1966_v40 = vpop.f32.mrb[0].mxu1 }
 0x150   :  { %v1946_v41 = vadd.f32 %v1945_v39, %v1944_v37  ;;  %v1947_v42 = vpop.f32.mrb[2].mxu0  ;;  %v1967_v43 = vpop.f32.mrb[1].mxu1  ;;  %v1889_v37 = vcombine.high %v1090_v34, %v1094_v36  ;;  %v1098_v39 = vld [vmem:[#allocation9 + $0x100] sm:$0xff] }
 0x151   :  { %v1948_v44 = vpop.f32.mrb[3].mxu0  ;;  %v1968_v46 = vadd.f32 %v1967_v43, %v1966_v40  ;;  %v1969_v47 = vpop.f32.mrb[2].mxu1  ;;  %v1102_v40 = vld [vmem:[#allocation9 + $0x120] sm:$0xff] }
 0x152   :  { %v707_v45 = vadd.f32 %v1946_v41, %v1781_v38  ;;  %v1970_v48 = vpop.f32.mrb[3].mxu1  ;;  %v1888_v38 = vcombine.low %v1090_v34, %v1094_v36  ;;  %v1897_v41 = vcombine.high %v1098_v39, %v1102_v40  ;;  %v1896_v42 = vcombine.low %v1098_v39, %v1102_v40  ;;  %v1106_v43 = vld [vmem:[#allocation9 + $0x140] sm:$0xff]  ;;  %v1855_v34 = vld [vmem:[%s2510_s6] ss:$0 sm:$0xff] }
 0x153   :  { %v1110_v44 = vld [vmem:[#allocation9 + $0x160] sm:$0xff]  ;;  %v1076_v39 = vld [vmem:[#allocation9 + $0x50] sm:$0xff] }
 0x154   :  { %v747_v49 = vadd.f32 %v1968_v46, %v707_v45  ;;  %v1905_v45 = vcombine.high %v1106_v43, %v1110_v44  ;;  %v1904_v46 = vcombine.low %v1106_v43, %v1110_v44  ;;  %v1114_v47 = vld [vmem:[#allocation9 + $0x180] sm:$0xff]  ;;  %v1081_v43 = vld [vmem:[#allocation9 + $0x78] sm:$0xff] }
 0x155   :  { %v1118_v48 = vld [vmem:[#allocation9 + $0x1a0] sm:$0xff] }
 0x16e   :  { %v1988_v50 = vpop.f32.mrb[4].mxu0 }
 0x16f   :  { %v1989_v51 = vpop.f32.mrb[5].mxu0  ;;  %v2010_v52 = vpop.f32.mrb[4].mxu1 }
 0x170   :  { %v1990_v53 = vadd.f32 %v1989_v51, %v1988_v50  ;;  %v1991_v54 = vpop.f32.mrb[6].mxu0  ;;  %v2011_v55 = vpop.f32.mrb[5].mxu1  ;;  %v1912_v50 = vcombine.low %v1114_v47, %v1118_v48 }
 0x171   :  { %v1992_v56 = vpop.f32.mrb[7].mxu0  ;;  %v2012_v58 = vadd.f32 %v2011_v55, %v2010_v52  ;;  %v2013_v59 = vpop.f32.mrb[6].mxu1  ;;  %v1079_v54 = vld [vmem:[#allocation9 + $0x68] sm:$0xff] }
 0x172   :  { %v787_v57 = vadd.f32 %v1990_v53, %v747_v49  ;;  %v2014_v60 = vpop.f32.mrb[7].mxu1  ;;  %v1913_v49 = vcombine.high %v1114_v47, %v1118_v48  ;;  %v1075_v53 = vld [vmem:[#allocation9 + $0x48] sm:$0xff] }
 0x173   :  { %v1087_v59 = vld [vmem:[#allocation9 + $0xa8] sm:$0xff]  ;;  %v1874_v60 = vcombine.low %v1075_v53, %v1079_v54 }
 0x174   :  { %v827_v61 = vadd.f32 %v2012_v58, %v787_v57  ;;  %v1875_v57 = vcombine.high %v1075_v53, %v1079_v54  ;;  %v1083_v58 = vld [vmem:[#allocation9 + $0x88] sm:$0xff] }
 0x175   :  { %v1882_v0 = vcombine.low %v1083_v58, %v1087_v59 }
 0x176   :  { %v832_v62 = vmax.f32 %v827_v61, 0.0  ;;  %v1883_v61 = vcombine.high %v1083_v58, %v1087_v59  ;;  %v1096_v58 = vld [vmem:[#allocation9 + $0xf0] sm:$0xff]  ;;  %v1093_v59 = vld [vmem:[#allocation9 + $0xd8] sm:$0xff] }
 0x178   :  { %v833_v63 = vpack.c.bf16 %v832_v62, %v832_v62  ;;  %v1091_v62 = vld [vmem:[#allocation9 + $0xc8] sm:$0xff] }
 0x17a   :  { %2051 = vmatmul.mubr.bf16.vlgmr.msra.gmra.mrb[8].mxu0 %v833_v63  ;;  %v1095_v63 = vld [vmem:[#allocation9 + $0xe8] sm:$0xff] }
 0x17b   :  { %1493 = vmatpush1.bf16.msra.mxu0 %v1864_v20  ;;  %v1891_v1 = vcombine.high %v1091_v62, %v1095_v63  ;;  %v1127_v20 = vld [vmem:[#allocation9 + $0x1e8] sm:$0xff] }
 0x17c   :  { %1494 = vmatprep.subr.bf16.mxu0 %v1873_v28  ;;  %v1922_v22 = vcombine.low %v1123_v18, %v1127_v20  ;;  %v1923_v23 = vcombine.high %v1123_v18, %v1127_v20  ;;  %v2300_v28 = vmov 0   ;;  %v1116_v18 = vld [vmem:[#allocation9 + $0x190] sm:$0xff]  ;;  %v1117_v20 = vld [vmem:[#allocation9 + $0x198] sm:$0xff] }
 0x17d   :  { %1524 = vmatprep.mubr.bf16.mxu0 %v2300_v28 }
 0x17f   :  { %1495 = vmatpush1.bf16.msra.mxu0 %v1872_v29 }
 0x180   :  { %1496 = vmatprep.subr.bf16.mxu0 %v1881_v27  ;;  %v1870_v27 = vcombine.low %v1069_v26, %v1073_v32 }
 0x183   :  { %1497 = vmatpush1.bf16.msra.mxu0 %v1880_v33  ;;  %v1871_v33 = vcombine.high %v1069_v26, %v1073_v32  ;;  %v1124_v26 = vld [vmem:[#allocation9 + $0x1d0] sm:$0xff] }
 0x184   :  { %1498 = vmatprep.subr.bf16.mxu0 %v1889_v37 }
 0x187   :  { %1499 = vmatpush1.bf16.msra.mxu0 %v1888_v38 }
 0x188   :  { %1500 = vmatprep.subr.bf16.mxu0 %v1897_v41  ;;  %v1080_v41 = vld [vmem:[#allocation9 + $0x70] sm:$0xff] }
 0x189   :  { %v1877_v47 = vcombine.high %v1076_v39, %v1080_v41  ;;  %v1876_v53 = vcombine.low %v1076_v39, %v1080_v41  ;;  %v1142_v39 = vsub.s32 2, %v2420_v30  ;;  %v1138_v41 = vsub.s32 1, %v2420_v30 }
 0x18b   :  { %1501 = vmatpush1.bf16.msra.mxu0 %v1896_v42  ;;  %v1077_v42 = vld [vmem:[#allocation9 + $0x58] sm:$0xff] }
 0x18c   :  { %1502 = vmatprep.subr.bf16.mxu0 %v1905_v45  ;;  %v1879_v48 = vcombine.high %v1077_v42, %v1081_v43  ;;  %v1878_v54 = vcombine.low %v1077_v42, %v1081_v43  ;;  %v1146_v42 = vsub.s32 3, %v2420_v30 }
 0x18f   :  { %1503 = vmatpush1.bf16.msra.mxu0 %v1904_v46 }
 0x190   :  { %1504 = vmatprep.subr.bf16.mxu0 %v1913_v49  ;;  %v1084_v49 = vld [vmem:[#allocation9 + $0x90] sm:$0xff] }
 0x193   :  { %1505 = vmatpush1.bf16.msra.mxu0 %v1912_v50  ;;  %v1088_v50 = vld [vmem:[#allocation9 + $0xb0] sm:$0xff] }
 0x194   :  { %1506 = vmatprep.subr.bf16.mxu0 %v1921_v19  ;;  %v1120_v19 = vld [vmem:[#allocation9 + $0x1b0] sm:$0xff] }
 0x195   :  { %v1916_v32 = vcombine.low %v1116_v18, %v1120_v19 }
 0x197   :  { %1507 = vmatpush1.bf16.msra.mxu0 %v1920_v21  ;;  %v1121_v21 = vld [vmem:[#allocation9 + $0x1b8] sm:$0xff] }
 0x24d   :  { %v939_v5 = vpop.f32.mrb[8].mxu0 }
 0x24e   :  { %v2455_v6 = vadd.f32 %v1846_v4, %v939_v5  ;;  %v2052_v7 = vpop.f32.mrb[9].mxu0  ;;  %v1890_v4 = vcombine.low %v1091_v62, %v1095_v63  ;;  %v1899_v5 = vcombine.high %v1099_v2, %v1103_v3 }
 0x24f   :  { %v942_v8 = vpop.f32.mrb[10].mxu0  ;;  %v1111_v7 = vld [vmem:[#allocation9 + $0x168] sm:$0xff] }
 0x250   :  { %v2053_v9 = vpop.f32.mrb[11].mxu0  ;;  %v945_v10 = vmul.f32 %v2455_v6, %v2455_v6  ;;  %v1898_v8 = vcombine.low %v1099_v2, %v1103_v3  ;;  %v1104_v2 = vld [vmem:[#allocation9 + $0x130] sm:$0xff]  ;;  %v1101_v3 = vld [vmem:[#allocation9 + $0x118] sm:$0xff] }
 0x252   :  { %v947_v11 = vsel %vm946_vm1, %v945_v10, 0.0  ;;  %v1115_v10 = vld [vmem:[#allocation9 + $0x188] sm:$0xff] }
 0x253   :  { %948 = vadd.xlane.f32.xlu0 %v947_v11  ;;  %v1119_v11 = vld [vmem:[#allocation9 + $0x1a8] sm:$0xff] }
 0x254   :  { %v1915_v13 = vcombine.high %v1115_v10, %v1119_v11  ;;  %v1914_v14 = vcombine.low %v1115_v10, %v1119_v11  ;;  %v1112_v10 = vld [vmem:[#allocation9 + $0x170] sm:$0xff]  ;;  %v1109_v11 = vld [vmem:[#allocation9 + $0x158] sm:$0xff] }
 0x2e0   :  { %v949_v51 = vpop.xlane.xlu0 %948 }
 0x2e1   :  { %2169 = vrsqrt.f32 %v949_v51  ;;  %v1085_v51 = vld [vmem:[#allocation9 + $0x98] sm:$0xff] }
 0x2eb   :  { %v2170_v52 = vpop.eup %2169 }
 0x2ec   :  { %v951_v55 = vmul.f32 %v2170_v52, %v2455_v6  ;;  %v1107_v6 = vld [vmem:[#allocation9 + $0x148] sm:$0xff]  ;;  %v1089_v52 = vld [vmem:[#allocation9 + $0xb8] sm:$0xff] }
 0x2ed   :  { %v1907_v9 = vcombine.high %v1107_v6, %v1111_v7  ;;  %v1906_v12 = vcombine.low %v1107_v6, %v1111_v7  ;;  %v1886_v62 = vcombine.low %v1085_v51, %v1089_v52 }
 0x2ee   :  { %v952_v56 = vpack.c.bf16 %v951_v55, %v951_v55  ;;  %v1885_v55 = vcombine.high %v1084_v49, %v1088_v50 }
 0x2f0   :  { %2071 = vmatmul.mubr.bf16.vlgmr.msra.gmra.mrb[8].mxu1 %v952_v56  ;;  %v1887_v56 = vcombine.high %v1085_v51, %v1089_v52 }
 0x2f1   :  { %1534 = vmatpush1.bf16.msra.mxu1 %v1866_v25  ;;  %v1072_v25 = vld [vmem:[#allocation9 + $0x30] sm:$0xff]  ;;  %1565 = vmatprep.mubr.bf16.mxu1 %v2300_v28 }
 0x2f2   :  { %1535 = vmatprep.subr.bf16.mxu1 %v1875_v57  ;;  %v1868_v29 = vcombine.low %v1068_v24, %v1072_v25  ;;  %v1869_v31 = vcombine.high %v1068_v24, %v1072_v25  ;;  %v1092_v57 = vld [vmem:[#allocation9 + $0xd0] sm:$0xff]  ;;  %v1917_v24 = vcombine.high %v1116_v18, %v1120_v19  ;;  %v1919_v25 = vcombine.high %v1117_v20, %v1121_v21 }
 0x2f3   :  { %v1893_v63 = vcombine.high %v1092_v57, %v1096_v58 }
 0x2f4   :  { %1574 = vmatprep.subr.bf16.mxu0 %v1869_v31  ;;  %v1129_v31 = vld [vmem:[#allocation9 + $0x1f8] sm:$0xff] }
 0x2f5   :  { %1536 = vmatpush1.bf16.msra.mxu1 %v1874_v60  ;;  %v1097_v60 = vld [vmem:[#allocation9 + $0xf8] sm:$0xff] }
 0x2f6   :  { %1537 = vmatprep.subr.bf16.mxu1 %v1883_v61  ;;  %v1884_v61 = vcombine.low %v1084_v49, %v1088_v50  ;;  %v1894_v6 = vcombine.low %v1093_v59, %v1097_v60 }
 0x2f9   :  { %1538 = vmatpush1.bf16.msra.mxu1 %v1882_v0  ;;  %v1895_v0 = vcombine.high %v1093_v59, %v1097_v60 }
 0x2fa   :  { %1539 = vmatprep.subr.bf16.mxu1 %v1891_v1  ;;  %v1100_v1 = vld [vmem:[#allocation9 + $0x110] sm:$0xff] }
 0x2fb   :  { %v1901_v7 = vcombine.high %v1100_v1, %v1104_v2 }
 0x2fd   :  { %1540 = vmatpush1.bf16.msra.mxu1 %v1890_v4  ;;  %v1105_v4 = vld [vmem:[#allocation9 + $0x138] sm:$0xff] }
 0x2fe   :  { %1541 = vmatprep.subr.bf16.mxu1 %v1899_v5  ;;  %v1892_v5 = vcombine.low %v1092_v57, %v1096_v58 }
 0x301   :  { %1542 = vmatpush1.bf16.msra.mxu1 %v1898_v8  ;;  %v1903_v8 = vcombine.high %v1101_v3, %v1105_v4 }
 0x302   :  { %1543 = vmatprep.subr.bf16.mxu1 %v1907_v9  ;;  %v1108_v9 = vld [vmem:[#allocation9 + $0x150] sm:$0xff] }
 0x303   :  { %v1909_v16 = vcombine.high %v1108_v9, %v1112_v10 }
 0x305   :  { %1544 = vmatpush1.bf16.msra.mxu1 %v1906_v12  ;;  %v1113_v12 = vld [vmem:[#allocation9 + $0x178] sm:$0xff] }
 0x306   :  { %1545 = vmatprep.subr.bf16.mxu1 %v1915_v13  ;;  %v1900_v13 = vcombine.low %v1100_v1, %v1104_v2  ;;  %v1911_v17 = vcombine.high %v1109_v11, %v1113_v12 }
 0x309   :  { %1546 = vmatpush1.bf16.msra.mxu1 %v1914_v14  ;;  %v1902_v14 = vcombine.low %v1101_v3, %v1105_v4  ;;  %v1150_v3 = vsub.s32 4, %v2420_v30  ;;  %v1158_v4 = vsub.s32 6, %v2420_v30 }
 0x30a   :  { %1547 = vmatprep.subr.bf16.mxu1 %v1923_v23  ;;  %v1910_v23 = vcombine.low %v1109_v11, %v1113_v12 }
 0x30d   :  { %1548 = vmatpush1.bf16.msra.mxu1 %v1922_v22  ;;  %v1908_v22 = vcombine.low %v1108_v9, %v1112_v10 }
 0x30e   :  { %1615 = vmatprep.subr.bf16.mxu1 %v1871_v33 }
 0x3c3   :  { %v1058_v36 = vpop.f32.mrb[8].mxu1 }
 0x3c4   :  { %v1059_v37 = vadd.f32 %v1855_v34, %v1058_v36  ;;  %v2072_v38 = vpop.f32.mrb[9].mxu1 }
 0x3c5   :  { %v1061_v40 = vpop.f32.mrb[10].mxu1  ;;  %v1134_v38 = vsub.s32 0, %v2420_v30 }
 0x3c6   :  { %v1064_v44 = vmax.f32 %v1059_v37, 0.0  ;;  %v2073_v45 = vpop.f32.mrb[11].mxu1  ;;  %v1130_v40 = vld [vmem:[%s2512_s8] sm:$0xff] }
 0x3c7   :  { %v1135_v43 = vrot.slane %v1130_v40, %v1134_v38  ;;  %v1139_v45 = vrot.slane %v1130_v40, %v1138_v41  ;;  %v1159_v9 = vrot.slane %v1130_v40, %v1158_v4 }
 0x3c8   :  { %v2467_v46 = vpack.c.bf16 %v1064_v44, %v1064_v44  ;;  %v1143_v44 = vrot.slane %v1130_v40, %v1142_v39 }
 0x3ca   :  { %1525 = vmatmul.mubr.bf16.vlgmr.msra.gmra.mrb[12].mxu0 %v2467_v46  ;;  %1566 = vmatmul.mubr.bf16.vlgmr.msra.gmra.mrb[12].mxu1 %v2467_v46 }
 0x3cb   :  { %1575 = vmatpush1.bf16.msra.mxu0 %v1868_v29  ;;  %1616 = vmatpush1.bf16.msra.mxu1 %v1870_v27  ;;  %v1125_v29 = vld [vmem:[#allocation9 + $0x1d8] sm:$0xff]  ;;  %v1918_v27 = vcombine.low %v1117_v20, %v1121_v21 }
 0x3cc   :  { %1576 = vmatprep.subr.bf16.mxu0 %v1877_v47  ;;  %1617 = vmatprep.subr.bf16.mxu1 %v1879_v48  ;;  %v1927_v34 = vcombine.high %v1125_v29, %v1129_v31  ;;  %v1926_v37 = vcombine.low %v1125_v29, %v1129_v31  ;;  %v1147_v47 = vrot.slane %v1130_v40, %v1146_v42 }
 0x3cd   :  { %1606 = vmatprep.mubr.bf16.mxu0 %v2300_v28  ;;  %1647 = vmatprep.mubr.bf16.mxu1 %v2300_v28  ;;  %v1128_v28 = vld [vmem:[#allocation9 + $0x1f0] sm:$0xff] }
 0x3ce   :  { %v1925_v33 = vcombine.high %v1124_v26, %v1128_v28  ;;  %v1924_v36 = vcombine.low %v1124_v26, %v1128_v28 }
 0x3cf   :  { %1577 = vmatpush1.bf16.msra.mxu0 %v1876_v53  ;;  %1618 = vmatpush1.bf16.msra.mxu1 %v1878_v54 }
 0x3d0   :  { %1578 = vmatprep.subr.bf16.mxu0 %v1885_v55  ;;  %1619 = vmatprep.subr.bf16.mxu1 %v1887_v56 }
 0x3d3   :  { %1579 = vmatpush1.bf16.msra.mxu0 %v1884_v61  ;;  %1620 = vmatpush1.bf16.msra.mxu1 %v1886_v62 }
 0x3d4   :  { %1580 = vmatprep.subr.bf16.mxu0 %v1893_v63  ;;  %1621 = vmatprep.subr.bf16.mxu1 %v1895_v0  ;;  %v2171_v0 = vld [vmem:[#allocation2] sm:$0xff] }
 0x3d7   :  { %1581 = vmatpush1.bf16.msra.mxu0 %v1892_v5  ;;  %1622 = vmatpush1.bf16.msra.mxu1 %v1894_v6  ;;  %v1154_v5 = vsub.s32 5, %v2420_v30  ;;  %v1162_v6 = vsub.s32 7, %v2420_v30 }
 0x3d8   :  { %1582 = vmatprep.subr.bf16.mxu0 %v1901_v7  ;;  %1623 = vmatprep.subr.bf16.mxu1 %v1903_v8  ;;  %v1151_v8 = vrot.slane %v1130_v40, %v1150_v3 }
 0x3d9   :  { %v1155_v10 = vrot.slane %v1130_v40, %v1154_v5  ;;  %v1163_v11 = vrot.slane %v1130_v40, %v1162_v6 }
 0x3db   :  { %1583 = vmatpush1.bf16.msra.mxu0 %v1900_v13  ;;  %1624 = vmatpush1.bf16.msra.mxu1 %v1902_v14 }
 0x3dc   :  { %1584 = vmatprep.subr.bf16.mxu0 %v1909_v16  ;;  %1625 = vmatprep.subr.bf16.mxu1 %v1911_v17 }
 0x3df   :  { %1585 = vmatpush1.bf16.msra.mxu0 %v1908_v22  ;;  %1626 = vmatpush1.bf16.msra.mxu1 %v1910_v23 }
 0x3e0   :  { %1586 = vmatprep.subr.bf16.mxu0 %v1917_v24  ;;  %1627 = vmatprep.subr.bf16.mxu1 %v1919_v25 }
 0x3e3   :  { %1587 = vmatpush1.bf16.msra.mxu0 %v1916_v32  ;;  %1628 = vmatpush1.bf16.msra.mxu1 %v1918_v27 }
 0x3e4   :  { %1588 = vmatprep.subr.bf16.mxu0 %v1925_v33  ;;  %1629 = vmatprep.subr.bf16.mxu1 %v1927_v34 }
 0x3e7   :  { %1589 = vmatpush1.bf16.msra.mxu0 %v1924_v36  ;;  %1630 = vmatpush1.bf16.msra.mxu1 %v1926_v37 }
 0x3ea   :  { %1607 = vmatmul.mubr.bf16.vlgmr.msra.gmra.mrb[16].mxu0 %v2467_v46  ;;  %1648 = vmatmul.mubr.bf16.vlgmr.msra.gmra.mrb[16].mxu1 %v2467_v46 }
 0x49d   :  { %v1526_v48 = vpop.f32.mrb[12].mxu0  ;;  %v1567_v49 = vpop.f32.mrb[12].mxu1 }
 0x49e   :  { %v1527_v50 = vadd.f32 %v1526_v48, %v1135_v43  ;;  %v1568_v46 = vadd.f32 %v1567_v49, %v1143_v44  ;;  %v1528_v51 = vpop.f32.mrb[13].mxu0  ;;  %v1569_v52 = vpop.f32.mrb[13].mxu1 }
 0x49f   :  { %v1529_v53 = vadd.f32 %v1528_v51, %v1139_v45  ;;  %v1570_v54 = vadd.f32 %v1569_v52, %v1147_v47  ;;  %v1530_v55 = vpop.f32.mrb[14].mxu0  ;;  %v1571_v56 = vpop.f32.mrb[14].mxu1 }
 0x4a0   :  { %v1531_v57 = vpop.f32.mrb[15].mxu0  ;;  %v1572_v58 = vpop.f32.mrb[15].mxu1 }
 0x4a1   :  { %v1664_v59 = vcombine.low %v1527_v50, %v1529_v53  ;;  %v1665_v60 = vcombine.low %v1568_v46, %v1570_v54 }
 0x4a3   :  { %v1672_v61 = vrot.slane %v1664_v59, %v2423_v35  ;;  %v1679_v62 = vrot.slane %v1665_v60, %v2423_v35 }
 0x4a5   :  { %v1680_v63 = vcombine.low %v1672_v61, %v1679_v62 }
 0x4a7   :  { %v1700_v1 = vsub.f32 %v2171_v0, %v1680_v63 }
 0x4a9   :  { %v1702_v2 = vmul.f32 %v1700_v1, %v1700_v1 }
 0x4ab   :  { %v1713_v7 = vrot.slane %v1702_v2, %v2423_v35  ;;  %v1706_v20 = vcombine.high %v1702_v2, %v1702_v2 }
 0x4ad   :  { %v1721_v12 = vcombine.high %v1713_v7, %v1713_v7  ;;  %v1720_v31 = vrot.slane %v1706_v20, %v2423_v35  ;;  %v1748_v32 = vsel %vm946_vm1, %v1713_v7, 0.0 }
 0x4af   :  { %v1749_v29 = vsel %vm946_vm1, %v1721_v12, 0.0  ;;  %v1722_v38 = vcombine.high %v1720_v31, %v1720_v31  ;;  %v1751_v39 = vsel %vm946_vm1, %v1720_v31, 0.0 }
 0x4b0   :  { %v1750_v34 = vadd.f32 %v1749_v29, %v1748_v32 }
 0x4b1   :  { %v1753_v44 = vsel %vm946_vm1, %v1722_v38, 0.0 }
 0x4b2   :  { %v1752_v40 = vadd.f32 %v1751_v39, %v1750_v34 }
 0x4b4   :  { %v1754_v45 = vadd.f32 %v1753_v44, %v1752_v40 }
 0x4bd   :  { %v1608_v13 = vpop.f32.mrb[16].mxu0  ;;  %v1649_v14 = vpop.f32.mrb[16].mxu1 }
 0x4be   :  { %v1609_v16 = vadd.f32 %v1608_v13, %v1151_v8  ;;  %v1650_v17 = vadd.f32 %v1649_v14, %v1159_v9  ;;  %v1610_v18 = vpop.f32.mrb[17].mxu0  ;;  %v1651_v19 = vpop.f32.mrb[17].mxu1 }
 0x4bf   :  { %v1611_v21 = vadd.f32 %v1610_v18, %v1155_v10  ;;  %v1652_v22 = vadd.f32 %v1651_v19, %v1163_v11  ;;  %v1612_v23 = vpop.f32.mrb[18].mxu0  ;;  %v1653_v24 = vpop.f32.mrb[18].mxu1 }
 0x4c0   :  { %v1613_v25 = vpop.f32.mrb[19].mxu0  ;;  %v1654_v30 = vpop.f32.mrb[19].mxu1 }
 0x4c1   :  { %v1681_v26 = vcombine.low %v1609_v16, %v1611_v21  ;;  %v1682_v28 = vcombine.low %v1650_v17, %v1652_v22 }
 0x4c3   :  { %v1689_v27 = vrot.slane %v1681_v26, %v2423_v35  ;;  %v1696_v33 = vrot.slane %v1682_v28, %v2423_v35 }
 0x4c5   :  { %v1697_v36 = vcombine.low %v1689_v27, %v1696_v33 }
 0x4c7   :  { %v1701_v37 = vsub.f32 %v2427_v15, %v1697_v36 }
 0x4c9   :  { %v1703_v41 = vmul.f32 %v1701_v37, %v1701_v37 }
 0x4cb   :  { %v1723_v42 = vcombine.high %v1703_v41, %v1703_v41  ;;  %v1730_v43 = vrot.slane %v1703_v41, %v2423_v35 }
 0x4cd   :  { %v1737_v47 = vrot.slane %v1723_v42, %v2423_v35  ;;  %v1738_v48 = vcombine.high %v1730_v43, %v1730_v43  ;;  %v1755_v49 = vsel %vm946_vm1, %v1730_v43, 0.0 }
 0x4ce   :  { %v1756_v50 = vadd.f32 %v1755_v49, %v1754_v45 }
 0x4cf   :  { %v1739_v46 = vcombine.high %v1737_v47, %v1737_v47  ;;  %v1757_v15 = vsel %vm946_vm1, %v1738_v48, 0.0  ;;  %v1759_v52 = vsel %vm946_vm1, %v1737_v47, 0.0 }
 0x4d0   :  { %v1758_v51 = vadd.f32 %v1757_v15, %v1756_v50 }
 0x4d1   :  { %v1761_v54 = vsel %vm946_vm1, %v1739_v46, 0.0 }
 0x4d2   :  { %v1760_v53 = vadd.f32 %v1759_v52, %v1758_v51 }
 0x4d4   :  { %v1762_v55 = vadd.f32 %v1761_v54, %v1760_v53 }
 0x4d6   :  { %1763 = vadd.xlane.f32.xlu0 %v1762_v55 }
 0x563   :  { %v1764_v56 = vpop.xlane.xlu0 %1763 }
 0x564   :  { %v1765_v57 = vmul.f32 0.5, %v1764_v56 }
 0x566   :  { %v1767_v58 = vmul.f32 100.0, %v1765_v57 }
 0x568   :  { %v1768_v59 = vsub.f32 1416.8541, %v1767_v58 }
 0x56a   :  { %v1769_v35 = vsub.f32 0.0, %v1768_v59 }
 0x56c   :  { %v1771_v60 = vmul.f32 0.0009765625, %v1769_v35 }
 0x56e   :  { %1773 = vst.msk [vmem:[%s2513_s9] sm:$0x3] %vm1772_vm2, %v1771_v60 }
 0x56f   :  { %1778 = vsyncpa [#allocation3], 1 }
 0x570   :  { %1779 = vsyncpa [#allocation5], 1 }
 0x571   :  { %1780 = vsyncpa [#allocation8], 1 }

</bundles_post_ra>
